<compile_context>
chip_gen: v6e
topology: v6e:2x2x1
jax: 0.10.0
libtpu: 0.0.40
codegen_flags: <defaults>
</compile_context>

<pallas_src>
import jax
import jax.numpy as jnp
from jax.experimental import pallas as pl
from jax.experimental.pallas import tpu as pltpu


# ----------------------------- Pallas kernel --------------------------------
def scaler_kernel(x_ref, wpre_ref, bpre_ref,
                  w1a_ref, w1b_ref, s1_ref,
                  w2_ref, s2_ref,
                  wout_ref, bout_ref,
                  o_ref, h_acc):
    """Grid = (batch_tiles [parallel], num_res_blocks [arbitrary])."""
    r = pl.program_id(1)
    xb = x_ref[...]                                    # (TB, INP) bf16

    # pre: Linear(IN -> C), only on the first residual-block step of this batch tile
    @pl.when(r == 0)
    def _():
        h_acc[...] = (
            jnp.dot(xb, wpre_ref[...], preferred_element_type=jnp.float32)
            + bpre_ref[...])

    # one residual block (fc1 on concat([h, x]) split into two matmuls; BN/bias folded)
    h = h_acc[...]                                     # (TB, C) f32
    hb = h.astype(jnp.bfloat16)
    t = (jnp.dot(hb, w1a_ref[0], preferred_element_type=jnp.float32)
         + jnp.dot(xb, w1b_ref[0], preferred_element_type=jnp.float32)
         + s1_ref[0])                                  # fc1 + folded BN1
    t = jnp.maximum(t, 0.0)                            # ReLU (dropout = identity, eval)
    t = (jnp.dot(t.astype(jnp.bfloat16), w2_ref[0],
                 preferred_element_type=jnp.float32)
         + s2_ref[0])                                  # fc2 + folded BN2
    t = jnp.maximum(t, 0.0)
    h_acc[...] = t + h                                 # residual add

    # out: Linear(C -> 1) as a VPU multiply + lane reduction (avoid N=1 MXU matmul)
    @pl.when(r == pl.num_programs(1) - 1)
    def _():
        o = jnp.sum(h_acc[...] * wout_ref[...], axis=-1, keepdims=True)   # (TB, 1)
        o_ref[...] = o + bout_ref[0, 0]


# ------------------------- host-side param folding ----------------------------
def _prepare_kernel_params(params, in_sz, in_pad):
    """Pad IN, fold eval-BN + biases into the fc weights, cast weights to bf16."""
    C = params["wpre"].shape[1]
    pad_rows = in_pad - in_sz

    wpre = params["wpre"]
    w1b = params["w1b"]
    if pad_rows:
        wpre = jnp.pad(wpre, ((0, pad_rows), (0, 0)))
        w1b = jnp.pad(w1b, ((0, 0), (0, pad_rows), (0, 0)))

    bn1s, bn1b = params["bn1s"], params["bn1b"]        # (R, 1, C)
    bn2s, bn2b = params["bn2s"], params["bn2b"]
    w1a = params["w1a"] * bn1s                         # scale fc1 columns by BN1 scale
    w1b = w1b * bn1s
    s1 = params["b1"] * bn1s + bn1b                    # fc1 bias + BN1 shift
    w2 = params["w2"] * bn2s
    s2 = params["b2"] * bn2s + bn2b

    bf = jnp.bfloat16
    f32 = jnp.float32
    return {
        "wpre": wpre.astype(bf),
        "bpre": params["bpre"].astype(f32),
        "w1a": w1a.astype(bf), "w1b": w1b.astype(bf), "s1": s1.astype(f32),
        "w2": w2.astype(bf), "s2": s2.astype(f32),
        "wout": params["wout"].reshape(1, C).astype(f32),   # row vector for VPU reduce
        "bout": params["bout"].reshape(1, 1).astype(f32),   # scalar, goes to SMEM
    }


# ------------------------------- wrapper -------------------------------------
def scaler_forward(x, params, *, num_res_blocks, batch_tile=128):
    bs = x.shape[0]
    x = x.reshape(bs, -1).astype(jnp.float32)          # x.view(bs, -1)
    in_sz = x.shape[1]
    C = params["wpre"].shape[1]
    R = num_res_blocks

    # pad feature dim to a lane multiple (128) and batch to a tile multiple
    in_pad = ((in_sz + 127) // 128) * 128
    if in_pad != in_sz:
        x = jnp.pad(x, ((0, 0), (0, in_pad - in_sz)))
    bs_pad = ((bs + batch_tile - 1) // batch_tile) * batch_tile
    if bs_pad != bs:
        x = jnp.pad(x, ((0, bs_pad - bs), (0, 0)))
    x = x.astype(jnp.bfloat16)                         # matmul-only operand -> bf16

    kp = _prepare_kernel_params(params, in_sz, in_pad)
    num_tiles = bs_pad // batch_tile

    def inv(*shape):        # grid-invariant (resident) block
        return pl.BlockSpec(shape, lambda i, r: (0,) * len(shape))

    def per_block(*shape):  # streamed per residual block along the r axis
        return pl.BlockSpec((1,) + shape[1:],
                            lambda i, r: (r,) + (0,) * (len(shape) - 1))

    grid_spec = pltpu.PrefetchScalarGridSpec(
        num_scalar_prefetch=0,
        grid=(num_tiles, R),
        in_specs=[
            pl.BlockSpec((batch_tile, in_pad), lambda i, r: (i, 0)),   # x (bf16)
            inv(in_pad, C), inv(1, C),                                  # pre: W, b
            per_block(R, C, C), per_block(R, in_pad, C), per_block(R, 1, C),  # fc1(+BN1)
            per_block(R, C, C), per_block(R, 1, C),                           # fc2(+BN2)
            inv(1, C),                                                  # wout row (f32)
            pl.BlockSpec(memory_space=pltpu.MemorySpace.SMEM),          # bout scalar
        ],
        out_specs=pl.BlockSpec((batch_tile, 1), lambda i, r: (i, 0)),
        scratch_shapes=[pltpu.VMEM((batch_tile, C), jnp.float32)],      # h carry
    )

    out = pl.pallas_call(
        scaler_kernel,
        out_shape=jax.ShapeDtypeStruct((bs_pad, 1), jnp.float32),
        grid_spec=grid_spec,
        compiler_params=pltpu.CompilerParams(
            dimension_semantics=("parallel", "arbitrary")),
    )(x, kp["wpre"], kp["bpre"],
      kp["w1a"], kp["w1b"], kp["s1"],
      kp["w2"], kp["s2"],
      kp["wout"], kp["bout"])
    return out[:bs]


# ------------------------- pure-JAX reference ---------------------------------
def scaler_reference(x, params, *, num_res_blocks):
    bs = x.shape[0]
    x = x.reshape(bs, -1)
    h = x @ params["wpre"] + params["bpre"]
    for r in range(num_res_blocks):
        res = h
        t = h @ params["w1a"][r] + x @ params["w1b"][r] + params["b1"][r]
        t = jnp.maximum(t * params["bn1s"][r] + params["bn1b"][r], 0.0)
        t = t @ params["w2"][r] + params["b2"][r]
        t = jnp.maximum(t * params["bn2s"][r] + params["bn2b"][r], 0.0)
        h = t + res
    return h @ params["wout"] + params["bout"]


# ------------------------- deterministic params -------------------------------
def make_params(key, input_size, num_channels, num_res_blocks):
    C, IN, R = num_channels, input_size, num_res_blocks
    ks = jax.random.split(key, 16)
    n = lambda k, s, scale=0.02: (scale * jax.random.normal(k, s)).astype(jnp.float32)
    eps = 1e-5

    def fold_bn(kg, kb, km, kv, shape):
        gamma = 1.0 + n(kg, shape, 0.1)
        beta = n(kb, shape, 0.1)
        mean = n(km, shape, 0.1)
        var = 1.0 + 0.1 * jax.random.uniform(kv, shape).astype(jnp.float32)
        scale = gamma / jnp.sqrt(var + eps)
        shift = beta - mean * scale
        return scale, shift

    bn1s, bn1b = fold_bn(ks[8], ks[9], ks[10], ks[11], (R, 1, C))
    bn2s, bn2b = fold_bn(ks[12], ks[13], ks[14], ks[15], (R, 1, C))

    return {
        "wpre": n(ks[0], (IN, C)), "bpre": n(ks[1], (1, C)),
        "w1a": n(ks[2], (R, C, C)), "w1b": n(ks[3], (R, IN, C)), "b1": n(ks[4], (R, 1, C)),
        "bn1s": bn1s, "bn1b": bn1b,
        "w2": n(ks[5], (R, C, C)), "b2": n(ks[6], (R, 1, C)),
        "bn2s": bn2s, "bn2b": bn2b,
        "wout": n(ks[7], (C, 1)), "bout": jnp.zeros((1, 1), jnp.float32),
    }


if __name__ == "__main__":
    BATCH = 256            # 2 batch tiles of 128 (keeps both v7x TCs busy)
    INPUT_SIZE = 37        # module default
    NUM_CHANNELS = 128     # scaled down from 1024 for the test
    NUM_RES_BLOCKS = 2

    key = jax.random.PRNGKey(0)
    k_x, k_p = jax.random.split(key)
    x = jax.random.normal(k_x, (BATCH, INPUT_SIZE), dtype=jnp.float32)
    params = make_params(k_p, INPUT_SIZE, NUM_CHANNELS, NUM_RES_BLOCKS)

    out = scaler_forward(x, params, num_res_blocks=NUM_RES_BLOCKS, batch_tile=128)
    out = jax.block_until_ready(out)

    ref = scaler_reference(x, params, num_res_blocks=NUM_RES_BLOCKS)
    assert out.shape == (BATCH, 1), out.shape
    # bf16 weights/activations vs f32 reference -> looser tolerance
    err = jnp.max(jnp.abs(out - ref))
    assert jnp.allclose(out, ref, atol=5e-3, rtol=2e-2), err
    print("KERNEL_OK")
</pallas_src>

<mosaic_0001>
module attributes {stable_mosaic.version = 11 : i64} {
  func.func @scaler_kernel(%arg0: i32, %arg1: i32, %arg2: memref<128x128xbf16, #tpu.memory_space<vmem>>, %arg3: memref<128x128xbf16, #tpu.memory_space<vmem>>, %arg4: memref<1x128xf32, #tpu.memory_space<vmem>>, %arg5: memref<1x128x128xbf16, #tpu.memory_space<vmem>>, %arg6: memref<1x128x128xbf16, #tpu.memory_space<vmem>>, %arg7: memref<1x1x128xf32, #tpu.memory_space<vmem>>, %arg8: memref<1x128x128xbf16, #tpu.memory_space<vmem>>, %arg9: memref<1x1x128xf32, #tpu.memory_space<vmem>>, %arg10: memref<1x128xf32, #tpu.memory_space<vmem>>, %arg11: memref<1x1xf32, #tpu.memory_space<smem>>, %arg12: memref<128x1xf32, #tpu.memory_space<vmem>>, %arg13: memref<128x128xf32, #tpu.memory_space<vmem>>) attributes {dimension_semantics = [#tpu.dimension_semantics<parallel>, #tpu.dimension_semantics<arbitrary>], iteration_bounds = array<i64: 2, 2>, scalar_prefetch = 0 : i64, scratch_operands = 1 : i64, tpu.core_type = #tpu.core_type<tc>, window_params = [{transform_indices = @transform_0, window_bounds = array<i64: 128, 128>}, {pipeline_mode = #tpu.pipeline_mode<synchronous>, transform_indices = @transform_1, window_bounds = array<i64: 128, 128>}, {pipeline_mode = #tpu.pipeline_mode<synchronous>, transform_indices = @transform_2, window_bounds = array<i64: 1, 128>}, {transform_indices = @transform_3, window_bounds = array<i64: 1, 128, 128>}, {transform_indices = @transform_4, window_bounds = array<i64: 1, 128, 128>}, {transform_indices = @transform_5, window_bounds = array<i64: 1, 1, 128>}, {transform_indices = @transform_6, window_bounds = array<i64: 1, 128, 128>}, {transform_indices = @transform_7, window_bounds = array<i64: 1, 1, 128>}, {pipeline_mode = #tpu.pipeline_mode<synchronous>, transform_indices = @transform_8, window_bounds = array<i64: 1, 128>}, {transform_indices = @transform_9, window_bounds = array<i64: 1, 1>}, {transform_indices = @transform_10, window_bounds = array<i64: 128, 1>}]} {
    %c0 = arith.constant 0 : index
    %c0_0 = arith.constant 0 : index
    %0 = vector.load %arg2[%c0, %c0_0] : memref<128x128xbf16, #tpu.memory_space<vmem>>, vector<128x128xbf16>
    %c0_i32 = arith.constant 0 : i32
    %1 = arith.cmpi eq, %arg1, %c0_i32 : i32
    %2 = arith.extui %1 : i1 to i32
    %c0_i32_1 = arith.constant 0 : i32
    %3 = arith.cmpi ne, %2, %c0_i32_1 : i32
    scf.if %3 {
      %c0_26 = arith.constant 0 : index
      %c0_27 = arith.constant 0 : index
      %34 = vector.load %arg3[%c0_26, %c0_27] : memref<128x128xbf16, #tpu.memory_space<vmem>>, vector<128x128xbf16>
      %cst_28 = arith.constant dense<0.000000e+00> : vector<128x128xf32>
      %35 = tpu.matmul %0, %34, %cst_28 {dimension_numbers = #tpu.dot_dimension_numbers<[1], [0], [0], [1], [0, 0, 1, 1], [], []>} : vector<128x128xbf16>, vector<128x128xbf16>, vector<128x128xf32> -> vector<128x128xf32>
      %c0_29 = arith.constant 0 : index
      %c0_30 = arith.constant 0 : index
      %36 = vector.load %arg4[%c0_29, %c0_30] : memref<1x128xf32, #tpu.memory_space<vmem>>, vector<1x128xf32>
      %37 = vector.broadcast %36 : vector<1x128xf32> to vector<128x128xf32>
      %38 = arith.addf %35, %37 : vector<128x128xf32>
      %c0_31 = arith.constant 0 : index
      %c0_32 = arith.constant 0 : index
      %39 = vector.load %arg13[%c0_31, %c0_32] : memref<128x128xf32, #tpu.memory_space<vmem>>, vector<128x128xf32>
      tpu.vector_store %arg13[%c0_31, %c0_32], %38 {strides = array<i32>} : memref<128x128xf32, #tpu.memory_space<vmem>>, vector<128x128xf32>,
    } else {
    }
    %c0_2 = arith.constant 0 : index
    %c0_3 = arith.constant 0 : index
    %4 = vector.load %arg13[%c0_2, %c0_3] : memref<128x128xf32, #tpu.memory_space<vmem>>, vector<128x128xf32>
    %5 = arith.truncf %4 : vector<128x128xf32> to vector<128x128xbf16>
    %c0_4 = arith.constant 0 : index
    %c0_5 = arith.constant 0 : index
    %c0_6 = arith.constant 0 : index
    %6 = vector.load %arg5[%c0_4, %c0_5, %c0_6] : memref<1x128x128xbf16, #tpu.memory_space<vmem>>, vector<1x128x128xbf16>
    %7 = vector.shape_cast %6 : vector<1x128x128xbf16> to vector<128x128xbf16>
    %cst = arith.constant dense<0.000000e+00> : vector<128x128xf32>
    %8 = tpu.matmul %5, %7, %cst {dimension_numbers = #tpu.dot_dimension_numbers<[1], [0], [0], [1], [0, 0, 1, 1], [], []>} : vector<128x128xbf16>, vector<128x128xbf16>, vector<128x128xf32> -> vector<128x128xf32>
    %c0_7 = arith.constant 0 : index
    %c0_8 = arith.constant 0 : index
    %c0_9 = arith.constant 0 : index
    %9 = vector.load %arg6[%c0_7, %c0_8, %c0_9] : memref<1x128x128xbf16, #tpu.memory_space<vmem>>, vector<1x128x128xbf16>
    %10 = vector.shape_cast %9 : vector<1x128x128xbf16> to vector<128x128xbf16>
    %cst_10 = arith.constant dense<0.000000e+00> : vector<128x128xf32>
    %11 = tpu.matmul %0, %10, %cst_10 {dimension_numbers = #tpu.dot_dimension_numbers<[1], [0], [0], [1], [0, 0, 1, 1], [], []>} : vector<128x128xbf16>, vector<128x128xbf16>, vector<128x128xf32> -> vector<128x128xf32>
    %12 = arith.addf %8, %11 : vector<128x128xf32>
    %c0_11 = arith.constant 0 : index
    %c0_12 = arith.constant 0 : index
    %c0_13 = arith.constant 0 : index
    %13 = vector.load %arg7[%c0_11, %c0_12, %c0_13] : memref<1x1x128xf32, #tpu.memory_space<vmem>>, vector<1x1x128xf32>
    %14 = vector.shape_cast %13 : vector<1x1x128xf32> to vector<1x128xf32>
    %15 = vector.broadcast %14 : vector<1x128xf32> to vector<128x128xf32>
    %16 = arith.addf %12, %15 : vector<128x128xf32>
    %cst_14 = arith.constant 0.000000e+00 : f32
    %17 = vector.broadcast %cst_14 : f32 to vector<128x128xf32>
    %18 = arith.maximumf %16, %17 : vector<128x128xf32>
    %19 = arith.truncf %18 : vector<128x128xf32> to vector<128x128xbf16>
    %c0_15 = arith.constant 0 : index
    %c0_16 = arith.constant 0 : index
    %c0_17 = arith.constant 0 : index
    %20 = vector.load %arg8[%c0_15, %c0_16, %c0_17] : memref<1x128x128xbf16, #tpu.memory_space<vmem>>, vector<1x128x128xbf16>
    %21 = vector.shape_cast %20 : vector<1x128x128xbf16> to vector<128x128xbf16>
    %cst_18 = arith.constant dense<0.000000e+00> : vector<128x128xf32>
    %22 = tpu.matmul %19, %21, %cst_18 {dimension_numbers = #tpu.dot_dimension_numbers<[1], [0], [0], [1], [0, 0, 1, 1], [], []>} : vector<128x128xbf16>, vector<128x128xbf16>, vector<128x128xf32> -> vector<128x128xf32>
    %c0_19 = arith.constant 0 : index
    %c0_20 = arith.constant 0 : index
    %c0_21 = arith.constant 0 : index
    %23 = vector.load %arg9[%c0_19, %c0_20, %c0_21] : memref<1x1x128xf32, #tpu.memory_space<vmem>>, vector<1x1x128xf32>
    %24 = vector.shape_cast %23 : vector<1x1x128xf32> to vector<1x128xf32>
    %25 = vector.broadcast %24 : vector<1x128xf32> to vector<128x128xf32>
    %26 = arith.addf %22, %25 : vector<128x128xf32>
    %cst_22 = arith.constant 0.000000e+00 : f32
    %27 = vector.broadcast %cst_22 : f32 to vector<128x128xf32>
    %28 = arith.maximumf %26, %27 : vector<128x128xf32>
    %29 = arith.addf %28, %4 : vector<128x128xf32>
    %c0_23 = arith.constant 0 : index
    %c0_24 = arith.constant 0 : index
    %30 = vector.load %arg13[%c0_23, %c0_24] : memref<128x128xf32, #tpu.memory_space<vmem>>, vector<128x128xf32>
    tpu.vector_store %arg13[%c0_23, %c0_24], %29 {strides = array<i32>} : memref<128x128xf32, #tpu.memory_space<vmem>>, vector<128x128xf32>,
    %c1_i32 = arith.constant 1 : i32
    %31 = arith.cmpi eq, %arg1, %c1_i32 : i32
    %32 = arith.extui %31 : i1 to i32
    %c0_i32_25 = arith.constant 0 : i32
    %33 = arith.cmpi ne, %32, %c0_i32_25 : i32
    scf.if %33 {
      %c0_26 = arith.constant 0 : index
      %c0_27 = arith.constant 0 : index
      %34 = vector.load %arg13[%c0_26, %c0_27] : memref<128x128xf32, #tpu.memory_space<vmem>>, vector<128x128xf32>
      %c0_28 = arith.constant 0 : index
      %c0_29 = arith.constant 0 : index
      %35 = vector.load %arg10[%c0_28, %c0_29] : memref<1x128xf32, #tpu.memory_space<vmem>>, vector<1x128xf32>
      %36 = vector.broadcast %35 : vector<1x128xf32> to vector<128x128xf32>
      %37 = arith.mulf %34, %36 : vector<128x128xf32>
      %cst_30 = arith.constant dense<0.000000e+00> : vector<128xf32>
      %38 = vector.multi_reduction <add>, %37, %cst_30 [1] : vector<128x128xf32> to vector<128xf32>
      %39 = vector.shape_cast %38 : vector<128xf32> to vector<128x1xf32>
      %c0_31 = arith.constant 0 : index
      %c0_32 = arith.constant 0 : index
      %40 = memref.load %arg11[%c0_31, %c0_32] : memref<1x1xf32, #tpu.memory_space<smem>>
      %41 = vector.broadcast %40 : f32 to vector<128x1xf32>
      %42 = arith.addf %39, %41 : vector<128x1xf32>
      %c0_33 = arith.constant 0 : index
      %c0_34 = arith.constant 0 : index
      %43 = vector.load %arg12[%c0_33, %c0_34] : memref<128x1xf32, #tpu.memory_space<vmem>>, vector<128x1xf32>
      tpu.vector_store %arg12[%c0_33, %c0_34], %42 {strides = array<i32>} : memref<128x1xf32, #tpu.memory_space<vmem>>, vector<128x1xf32>,
    } else {
    }
    return
  }
  func.func @transform_0(%arg0: i32, %arg1: i32) -> (i32, i32) {
    %c0_i32 = arith.constant 0 : i32
    %c0_i32_0 = arith.constant 0 : i32
    return %arg0, %c0_i32 : i32, i32
  }
  func.func @transform_1(%arg0: i32, %arg1: i32) -> (i32, i32) {
    %c0_i32 = arith.constant 0 : i32
    %c0_i32_0 = arith.constant 0 : i32
    %c0_i32_1 = arith.constant 0 : i32
    return %c0_i32, %c0_i32_0 : i32, i32
  }
  func.func @transform_2(%arg0: i32, %arg1: i32) -> (i32, i32) {
    %c0_i32 = arith.constant 0 : i32
    %c0_i32_0 = arith.constant 0 : i32
    %c0_i32_1 = arith.constant 0 : i32
    return %c0_i32, %c0_i32_0 : i32, i32
  }
  func.func @transform_3(%arg0: i32, %arg1: i32) -> (i32, i32, i32) {
    %c0_i32 = arith.constant 0 : i32
    %c0_i32_0 = arith.constant 0 : i32
    %c0_i32_1 = arith.constant 0 : i32
    return %arg1, %c0_i32, %c0_i32_0 : i32, i32, i32
  }
  func.func @transform_4(%arg0: i32, %arg1: i32) -> (i32, i32, i32) {
    %c0_i32 = arith.constant 0 : i32
    %c0_i32_0 = arith.constant 0 : i32
    %c0_i32_1 = arith.constant 0 : i32
    return %arg1, %c0_i32, %c0_i32_0 : i32, i32, i32
  }
  func.func @transform_5(%arg0: i32, %arg1: i32) -> (i32, i32, i32) {
    %c0_i32 = arith.constant 0 : i32
    %c0_i32_0 = arith.constant 0 : i32
    %c0_i32_1 = arith.constant 0 : i32
    return %arg1, %c0_i32, %c0_i32_0 : i32, i32, i32
  }
  func.func @transform_6(%arg0: i32, %arg1: i32) -> (i32, i32, i32) {
    %c0_i32 = arith.constant 0 : i32
    %c0_i32_0 = arith.constant 0 : i32
    %c0_i32_1 = arith.constant 0 : i32
    return %arg1, %c0_i32, %c0_i32_0 : i32, i32, i32
  }
  func.func @transform_7(%arg0: i32, %arg1: i32) -> (i32, i32, i32) {
    %c0_i32 = arith.constant 0 : i32
    %c0_i32_0 = arith.constant 0 : i32
    %c0_i32_1 = arith.constant 0 : i32
    return %arg1, %c0_i32, %c0_i32_0 : i32, i32, i32
  }
  func.func @transform_8(%arg0: i32, %arg1: i32) -> (i32, i32) {
    %c0_i32 = arith.constant 0 : i32
    %c0_i32_0 = arith.constant 0 : i32
    %c0_i32_1 = arith.constant 0 : i32
    return %c0_i32, %c0_i32_0 : i32, i32
  }
  func.func @transform_9(%arg0: i32, %arg1: i32) -> (i32, i32) {
    %c0_i32 = arith.constant 0 : i32
    %c0_i32_0 = arith.constant 0 : i32
    %c0_i32_1 = arith.constant 0 : i32
    return %c0_i32, %c0_i32_0 : i32, i32
  }
  func.func @transform_10(%arg0: i32, %arg1: i32) -> (i32, i32) {
    %c0_i32 = arith.constant 0 : i32
    %c0_i32_0 = arith.constant 0 : i32
    return %arg0, %c0_i32 : i32, i32
  }
}

</mosaic_0001>

<bundles_post_ra>
// kernel: tpu_custom_call.1
= control target key start
LH: loop header
LB: loop body
LE: loop exit
PB: predicated region body
PF: predicated region fallthrough
CT: control target
= control target key end

     0   :  { %s3054_s0 = inlined_call_operand.hbm [shape: bf16[256,128], index: 0, kind: input, shape index: {}]   ;;  %s3055_s1 = inlined_call_operand.hbm [shape: bf16[128,128], index: 1, kind: input, shape index: {}]   ;;  %s3056_s2 = inlined_call_operand.vmem [shape: f32[1,128], index: 2, kind: input, shape index: {}]   ;;  %s3057_s3 = inlined_call_operand.hbm [shape: bf16[2,128,128], index: 3, kind: input, shape index: {}]   ;;  %s3058_s4 = inlined_call_operand.hbm [shape: bf16[2,128,128], index: 4, kind: input, shape index: {}]   ;;  %s3059_s5 = inlined_call_operand.vmem [shape: f32[2,1,128], index: 5, kind: input, shape index: {}]   ;;  %s3060_s6 = inlined_call_operand.hbm [shape: bf16[2,128,128], index: 6, kind: input, shape index: {}]   ;;  %s3061_s7 = inlined_call_operand.vmem [shape: f32[2,1,128], index: 7, kind: input, shape index: {}]   ;;  %s3062_s8 = inlined_call_operand.vmem [shape: f32[1,128], index: 8, kind: input, shape index: {}]   ;;  %s3063_s9 = inlined_call_operand.<no memory space> [shape: f32[1,1], index: 9, kind: input, shape index: {}]   ;;  %s3064_s10 = inlined_call_operand.vmem [shape: f32[256,1], index: 10, kind: output, shape index: {}]  }
   0x1   :  { %3076 = sst [smem:[#allocation21_spill]] %s3054_s0 }
   0x2   :  { %3077 = sst [smem:[#allocation22_spill]] %s3056_s2 }
   0x3   :  { %3078 = sst [smem:[#allocation23_spill]] %s3057_s3 }
   0x4   :  { %3079 = sst [smem:[#allocation24_spill]] %s3058_s4 }
   0x5   :  { %3080 = sst [smem:[#allocation25_spill]] %s3062_s8 }
   0x6   :  { %3081 = sst [smem:[#allocation26_spill]] %s3064_s10 }
   0x7   :  { %15 = sst [smem:[#allocation3]] %s3063_s9 }
   0x8   :  { %16 = vsyncpa [#allocation5], 0 }
   0x9   :  { %18 = vsyncpa [#allocation5 + $0x1], 0 }
   0xa   :  { %19 = vsyncpa [#allocation7], 0  ;;  %s2503_s15 = smov 0   ;;  %s2505_s16 = smov 0  }
   0xb   :  { %s2507_s17 = smov 0   ;;  %s2509_s18 = smov 0  }
   0xc   :  { %s2511_s19 = smov 0   ;;  %s2513_s20 = smov 0  }
   0xd   :  { %s2515_s21 = smov 0   ;;  %s2517_s22 = smov 0  }
   0xe   :  { %s2519_s9 = smov 0   ;;  %s2521_s23 = smov 0  }
   0xf   :  { %s2523_s24 = smov 0  }
  0x10 LB: > { %3082 = sst [smem:[#allocation14_spill]] %s2416_s20  ;;  %p51_p0 = scmp.ne.s32.totalorder %s2416_s20, %s2412_s19  ;;  %s2436_s24 = sphi %s2523_s24, %s25_s24   ;;  %s2432_s23 = sphi %s2521_s23, %s3114_s23   ;;  %s2428_s9 = sphi %s2519_s9, %s3113_s9   ;;  %s2424_s22 = sphi %s2517_s22, %s3112_s22   ;;  %s2420_s21 = sphi %s2515_s21, %s3111_s21   ;;  %s2416_s20 = sphi %s2513_s20, %s3110_s20   ;;  %s2412_s19 = sphi %s2511_s19, %s3119_s19   ;;  %s2408_s18 = sphi %s2509_s18, %s3118_s18   ;;  %s2404_s17 = sphi %s2507_s17, %s3117_s17   ;;  %s2400_s16 = sphi %s2505_s16, %s3116_s16   ;;  %s2396_s15 = sphi %s2503_s15, %s3115_s15  }
  0x11   : > { %3083 = sst [smem:[#allocation15_spill]] %s2428_s9  ;;  %p52_p1 = scmp.eq.s32.totalorder %s2436_s24, 0 }
  0x12   : > { %3084 = sst [smem:[#allocation16_spill]] %s2432_s23  ;;  %p2075_p3 = scmp.lt.s32.totalorder %s2436_s24, 4 }
  0x13   : > { %p53_p2 = por %p52_p1, %p51_p0  ;;  %s343_s27 = sand.u32 1, %s2436_s24  }
  0x14   : > { %s345_s28 = sand.u32 1, %s2416_s20   ;;  %s1817_s30 = sshll.u32 %s2432_s23, 10 }
  0x15   : > { %s1741_s29 = sshll.u32 %s345_s28, 6  ;;  %s3085_s0 = sld [smem:[#allocation21_spill]] }
  0x16   : > { %s347_s14 = scalar_lea.vmem [#allocation4], %s1741_s29  ;;  %p2574_p4 = pnand %p2075_p3, %p53_p2 }
  0x17   : > { %s354_s8 = sshll.u32 %s347_s14, 4  ;;  %s2578_s26 = scalar_lea.sflag [#allocation5], %s343_s27  ;;  %s355_s8 = int_to_ptr.vmem [resolvable:$true] %s354_s8 }
  0x18   : > { %p2202_p5 = pneg %p2574_p4  ;;  %s2213_s25 = scalar_lea.vmem %s355_s8, 1024 }
  0x19   : > { %p2214_p6 = scmp.ne.s32.totalorder %s355_s8, %s2213_s25  ;;  %s2438_s28 = smov [#allocation4]  }
  0x1a   : > { %s2218_s11 = sshll.u32 %s2438_s28, 4  ;;  %s2219_s11 = int_to_ptr.vmem [resolvable:$false] %s2218_s11 }
  0x1b   : > { %s353_s13 = scalar_lea.hbm %s3085_s0, %s1817_s30  ;;  %p2216_p7 = pnand %p2214_p6, %p2202_p5 }
  0x1c   : > { %s2220_s29 = scalar_lea.vmem %s2219_s11, 2048  ;;  %p2221_p9 = scmp.lt.s32.totalorder %s355_s8, %s2219_s11 }
  0x1d   : > { %p2217_p8 = pneg %p2216_p7  ;;  %p2222_p10 = scmp.lt.s32.totalorder %s2220_s29, %s2213_s25 }
  0x1f   : > { %p2223_p11 = por %p2222_p10, %p2221_p9 }
  0x21   : > { %p2224_p12 = pnand %p2223_p11, %p2217_p8 }
  0x23   : > { %2227 = shalt.err (!%p2224_p12)
}
  0x24   : > { %s3065_s30 = smov 64   ;;  %s3067_s27 = smov 4  }
  0x25   : > { %2064 = dma.hbm_to_vmem [thread:$0]  (!%p2574_p4), %s353_s13, 1024, %s355_s8, %s2578_s26, %s3065_s30, %s3065_s30, %s3067_s27  }
  0x26   : > { %s34_s25 = sadd.s32 1, %s2428_s9  ;;  %s112_s12 = sadd.s32 1, %s2404_s17 }
  0x27   : > { %p35_p13 = scmp.ge.s32.totalorder %s34_s25, 2  ;;  %p119_p0 = scmp.ne.s32.totalorder %s2404_s17, %s2400_s16 }
  0x28   : > { %s366_s14 = sand.u32 1, %s2404_s17   ;;  %s2594_s28 = sshll.u32 %s2428_s9, 10 }
  0x29   : > { %s3121_s25 = smov (%p35_p13, %s34_s25), 0  ;;  %s3088_s11 = sadd.s32 1, %s2432_s23 }
  0x2a   : > { %3087 = sst [smem:[#allocation17_spill]] %s3121_s25  ;;  %s3123_s11 = smov (!%p35_p13, %s3088_s11), %s2432_s23 }
  0x2b   : > { %s109_s2 = ssub.s32 %s2428_s9, %s3121_s25  ;;  %p121_p2 = por %p119_p0, %p52_p1 }
  0x2c   : > { %p39_p4 = scmp.ge.s32.totalorder %s3123_s11, 2  ;;  %p110_p5 = scmp.eq.s32.totalorder %s109_s2, 0 }
  0x2d   : > { %s2605_s8 = sshll.u32 %s366_s14, 6  ;;  %s3089_s3 = sld [smem:[#allocation23_spill]] }
  0x2e   : > { %s3125_s11 = smov (%p39_p4, %s3123_s11), 0  ;;  %s368_s10 = scalar_lea.vmem [#allocation8], %s2605_s8 }
  0x2f   : > { %3090 = sst [smem:[#allocation18_spill]] %s3125_s11  ;;  %s41_s0 = ssub.s32 %s2432_s23, %s3125_s11 }
  0x30   : > { %s2614_s27 = scalar_select %p110_p5, %s2404_s17, %s112_s12  }
  0x31   : > { %p42_p6 = scmp.eq.s32.totalorder %s41_s0, 0  ;;  %s375_s25 = sshll.u32 %s368_s10, 4  ;;  %s376_s25 = int_to_ptr.vmem [resolvable:$true] %s375_s25 }
  0x32   : > { %3091 = sst [smem:[#allocation19_spill]] %s2614_s27  ;;  %p2621_p1 = pnand %p2075_p3, %p121_p2 }
  0x33   : > { %s374_s30 = scalar_lea.hbm %s3089_s3, %s2594_s28  ;;  %s3093_s14 = sadd.s32 1, %s2416_s20 }
  0x34   : > { %s2628_s13 = scalar_select %p42_p6, %s2416_s20, %s3093_s14  }
  0x35   : > { %p2230_p7 = pneg %p2621_p1  ;;  %s2241_s29 = scalar_lea.vmem %s376_s25, 1024 }
  0x36   : > { %3094 = sst [smem:[#allocation20_spill]] %s2628_s13  ;;  %p2242_p8 = scmp.ne.s32.totalorder %s376_s25, %s2241_s29 }
  0x37   : > { %s2441_s0 = smov [#allocation8]  }
  0x38   : > { %p2244_p9 = pnand %p2242_p8, %p2230_p7  ;;  %s2246_s10 = sshll.u32 %s2441_s0, 4  ;;  %s2247_s10 = int_to_ptr.vmem [resolvable:$false] %s2246_s10 }
  0x39   : > { %s2248_s12 = scalar_lea.vmem %s2247_s10, 2048  ;;  %p2249_p3 = scmp.lt.s32.totalorder %s376_s25, %s2247_s10 }
  0x3a   : > { %p2245_p10 = pneg %p2244_p9  ;;  %p2250_p11 = scmp.lt.s32.totalorder %s2248_s12, %s2241_s29 }
  0x3c   : > { %p2251_p12 = por %p2250_p11, %p2249_p3 }
  0x3e   : > { %p2252_p13 = pnand %p2251_p12, %p2245_p10 }
  0x40   : > { %2255 = shalt.err (!%p2252_p13)
}
  0x41   : > { %s3095_s14 = smov 4   ;;  %s3096_s3 = smov 64  }
  0x42   : > { %2067 = dma.hbm_to_vmem [thread:$0]  (!%p2621_p1), %s374_s30, 1024, %s376_s25, %s2578_s26, %s3096_s3, %s3096_s3, %s3095_s14  }
  0x43   : > { %s3097_s4 = sld [smem:[#allocation24_spill]]  ;;  %s389_s9 = scalar_lea.vmem [#allocation9], %s2605_s8 }
  0x44   : > { %s396_s10 = sshll.u32 %s389_s9, 4  ;;  %s2442_s12 = smov [#allocation9]   ;;  %s397_s10 = int_to_ptr.vmem [resolvable:$true] %s396_s10 }
  0x45   : > { %s2269_s29 = scalar_lea.vmem %s397_s10, 1024  ;;  %s2274_s13 = sshll.u32 %s2442_s12, 4  ;;  %s2275_s13 = int_to_ptr.vmem [resolvable:$false] %s2274_s13 }
  0x46   : > { %p2270_p0 = scmp.ne.s32.totalorder %s397_s10, %s2269_s29  ;;  %s2276_s20 = scalar_lea.vmem %s2275_s13, 2048 }
  0x47   : > { %p2277_p5 = scmp.lt.s32.totalorder %s397_s10, %s2275_s13  ;;  %p2278_p6 = scmp.lt.s32.totalorder %s2276_s20, %s2269_s29 }
  0x48   : > { %p2272_p2 = pnand %p2270_p0, %p2230_p7 }
  0x49   : > { %s395_s0 = scalar_lea.hbm %s3097_s4, %s2594_s28  ;;  %p2279_p8 = por %p2278_p6, %p2277_p5 }
  0x4a   : > { %p2273_p4 = pneg %p2272_p2 }
  0x4c   : > { %p2280_p9 = pnand %p2279_p8, %p2273_p4 }
  0x4e   : > { %2283 = shalt.err (!%p2280_p9)
}
  0x4f   : > { %2070 = dma.hbm_to_vmem [thread:$0]  (!%p2621_p1), %s395_s0, 1024, %s397_s10, %s2578_s26, %s3096_s3, %s3096_s3, %s3095_s14  }
  0x50   : > { %s3074_s20 = sadd.s32 4294967295, %s2436_s24   ;;  %p57_p10 = scmp.ne.s32.totalorder %s2412_s19, %s2408_s18 }
  0x51   : > { %p2660_p3 = scmp.eq.s32.totalorder %s3074_s20, 0  ;;  %p125_p11 = scmp.ne.s32.totalorder %s2400_s16, %s2396_s15 }
  0x52   : > { %p1738_p12 = scmp.ge.s32.totalorder %s2436_s24, 1  ;;  %p308_p0 = scmp.lt.s32.totalorder %s2436_s24, 5 }
  0x53   : > { %p2669_p13 = por %p2660_p3, %p57_p10  ;;  %p2676_p2 = por %p125_p11, %p2660_p3 }
  0x54   : > { %p2680_p4 = pnand %p1738_p12, %p308_p0  ;;  %s2443_s25 = smov [#allocation6]  }
  0x55   : > { %s3100_s18 = scalar_select %p2676_p2, 1, 0 }
  0x56   : > { %s320_s15 = sshll.u32 %s2443_s25, 4  ;;  %p2057_p5 = pneg %p2680_p4  ;;  %s2686_s15 = int_to_ptr.vmem [resolvable:$true] %s320_s15 }
  0x57   : > { %s422_s0 = scalar_lea.hbm %s3060_s6, %s2594_s28  ;;  %s416_s10 = scalar_lea.vmem [#allocation10], %s2605_s8 }
  0x58   : > { %s423_s29 = sshll.u32 %s416_s10, 4  ;;  %p2695_p6 = pnand %p2057_p5, %p2660_p3  ;;  %s424_s29 = int_to_ptr.vmem [resolvable:$true] %s423_s29 }
  0x59   : > { %s2297_s20 = scalar_lea.vmem %s424_s29, 1024  ;;  %s2444_s25 = smov [#allocation10]  }
  0x5a   : > { %p2298_p8 = scmp.ne.s32.totalorder %s424_s29, %s2297_s20  ;;  %s2302_s4 = sshll.u32 %s2444_s25, 4  ;;  %s2303_s4 = int_to_ptr.vmem [resolvable:$false] %s2302_s4 }
  0x5b   : > { %s2304_s27 = scalar_lea.vmem %s2303_s4, 2048  ;;  %p2305_p11 = scmp.lt.s32.totalorder %s424_s29, %s2303_s4 }
  0x5c   : > { %p2300_p9 = pnand %p2298_p8, %p2230_p7  ;;  %p2306_p12 = scmp.lt.s32.totalorder %s2304_s27, %s2297_s20 }
  0x5e   : > { %p2301_p10 = pneg %p2300_p9  ;;  %p2307_p0 = por %p2306_p12, %p2305_p11 }
  0x60   : > { %p2308_p2 = pnand %p2307_p0, %p2301_p10 }
  0x62   : > { %2311 = shalt.err (!%p2308_p2)
}
  0x63   : > { %2073 = dma.hbm_to_vmem [thread:$0]  (!%p2621_p1), %s422_s0, 1024, %s424_s29, %s2578_s26, %s3096_s3, %s3096_s3, %s3095_s14  }
  0x64   : > { %p2314_p7 = pneg %p2695_p6  ;;  %s2323_s28 = scalar_lea.vmem %s2686_s15, 1024 }
  0x65   : > { %p2324_p5 = scmp.ne.s32.totalorder %s2686_s15, %s2323_s28  ;;  %p2331_p10 = scmp.lt.s32.totalorder %s2686_s15, %s2686_s15 }
  0x66   : > { %p2332_p2 = scmp.lt.s32.totalorder %s2323_s28, %s2323_s28 }
  0x67   : > { %p2326_p8 = pnand %p2324_p5, %p2314_p7 }
  0x68   : > { %p2333_p11 = por %p2332_p2, %p2331_p10 }
  0x69   : > { %p2327_p9 = pneg %p2326_p8 }
  0x6b   : > { %p2334_p12 = pnand %p2333_p11, %p2327_p9 }
  0x6d   : > { %2337 = shalt.err (!%p2334_p12)
}
  0x6e   : > { %2060 = dma.hbm_to_vmem [thread:$0]  (!%p2695_p6), %s3055_s1, 1024, %s2686_s15, [#allocation7], %s3096_s3, %s3096_s3, %s3095_s14  }
  0x6f   : > { %441 = sbr.rel (%p2680_p4) target bundleno = 1024 (0x400), region = 60  ;;  %s3103_s27 = sadd.s32 (!%p2680_p4), 4294967295, %s2436_s24  }
  0x70   : > { %s443_s8 = sand.u32 (!%p2680_p4), 1, %s3103_s27   ;;  %s445_s2 = sand.u32 (!%p2680_p4), 1, %s2412_s19  }
  0x71   : > { %s1754_s20 = sshll.u32 (!%p2680_p4), %s445_s2, 6  ;;  %s444_s11 = scalar_lea.sflag (!%p2680_p4), [#allocation5], %s443_s8 }
  0x72   : > { %s2728_s13 = scalar_lea.vmem (!%p2680_p4), [#allocation4], %s1754_s20 }
  0x74   : > { %2383 = dma.done.wait (%p2669_p13), %s444_s11, 1024  }
  0x75   : > { %2385 = vsyncadd (%p2669_p13), %s444_s11, 4294966272 }
  0x76   : > { %2387 = dma.done.wait (%p2660_p3), [#allocation7], 1024  }
  0x77   : > { %2389 = vsyncadd (%p2660_p3), [#allocation7], 4294966272  ;;  %s458_s3 = sand.u32 1, %s2400_s16   ;;  %p3104_p1 = scmp.ne.s32.totalorder %s3100_s18, 0 }
  0x78   : > { %s1756_s14 = sshll.u32 %s458_s3, 6 }
  0x79   : > { %s2739_s30 = scalar_lea.vmem [#allocation8], %s1756_s14 }
  0x7a   : > { %2391 = dma.done.wait (%p3104_p1), %s444_s11, 3072  }
  0x7b   : > { %2393 = vsyncadd (%p3104_p1), %s444_s11, 4294964224  ;;  %p537_p3 = scmp.lt.s32.totalorder %s2420_s21, 1  ;;  %s1759_s9 = sshll.u32 %s2424_s22, 4  ;;  %v2759_v0 = vld [vmem:[%s2728_s13] sm:$0xf] }
  0x7c   : > { %p544_p13 = scmp.lt.s32.totalorder %s1759_s9, 31  ;;  %v2762_v1 = vld [vmem:[%s2728_s13 + $0x4] sm:$0xf]  ;;  %v2765_v2 = vld [vmem:[%s2728_s13 + $0x8] sm:$0xf]  ;;  %s3105_s4 = sld [smem:[#allocation26_spill]] }
  0x7d   : > { %s2748_s23 = scalar_select %p537_p3, %s2420_s21, 1  ;;  %v2773_v3 = vld [vmem:[%s2728_s13 + $0xc] sm:$0xf]  ;;  %v2776_v4 = vld [vmem:[%s2728_s13 + $0x10] sm:$0xf] }
  0x7e   : > { %s3127_s9 = smov (!%p544_p13, %s1759_s9), 31  ;;  %v2779_v5 = vld [vmem:[%s2728_s13 + $0x14] sm:$0xf]  ;;  %v2782_v6 = vld [vmem:[%s2728_s13 + $0x18] sm:$0xf]  ;;  %s2811_s27 = scalar_lea.vmem [#allocation9], %s1756_s14 }
  0x7f   : > { %s539_s0 = scalar_lea.vmem %s3059_s5, %s2748_s23  ;;  %s542_s12 = scalar_lea.vmem %s3061_s7, %s2748_s23  ;;  %v2785_v7 = vld [vmem:[%s2728_s13 + $0x1c] sm:$0xf]  ;;  %v2788_v8 = vld [vmem:[%s2728_s13 + $0x20] sm:$0xf]  ;;  %v2791_v9 = vld [vmem:[%s2728_s13 + $0x24] sm:$0xf] }
  0x80   : > { %s1760_s22 = sshll.u32 %s3127_s9, 3  ;;  %v2794_v10 = vld [vmem:[%s2728_s13 + $0x28] sm:$0xf]  ;;  %v2797_v11 = vld [vmem:[%s2728_s13 + $0x2c] sm:$0xf]  ;;  %s2813_s8 = scalar_lea.vmem [#allocation10], %s1756_s14 }
  0x81   : > { %v2800_v12 = vld [vmem:[%s2728_s13 + $0x30] sm:$0xf]  ;;  %v2803_v13 = vld [vmem:[%s2728_s13 + $0x34] sm:$0xf]  ;;  %v2806_v14 = vld [vmem:[%s2728_s13 + $0x38] sm:$0xf] }
  0x82   : > { %s2770_s26 = scalar_lea.vmem %s3105_s4, %s1760_s22  ;;  %v2809_v15 = vld [vmem:[%s2728_s13 + $0x3c] sm:$0xf]  ;;  %p1761_p4 = scmp.ne.s32.totalorder %s2420_s21, 0 }
  0x83   : > { %s3106_s11 = sld [smem:[#allocation22_spill]] (!%p1761_p4) }
  0x84   : > { %569 = sbr.rel (%p1761_p4) target bundleno = 380 (0x17c), region = 84 }
  0x89   : > { %v2168_v16 = vld [vmem:[#allocation6 + $0x38] sm:$0xff]   ;;  %v2169_v17 = vld [vmem:[#allocation6 + $0x30] sm:$0xff]   ;;  %v1763_v18 = vcombine.low %v2759_v0, %v2762_v1  ;;  %v1767_v19 = vcombine.low %v2788_v8, %v2791_v9  ;;  %v2170_v20 = vld [vmem:[#allocation6 + $0x28] sm:$0xff]   ;;  %v1764_v26 = vcombine.low %v2765_v2, %v2773_v3  ;;  %v1768_v27 = vcombine.low %v2794_v10, %v2797_v11 }
  0x8a   : > { %1885 = vmatprep.subr.bf16.mxu0 %v2168_v16  ;;  %2013 = vmatprep.subr.bf16.mxu1 %v2168_v16  ;;  %v2171_v21 = vld [vmem:[#allocation6 + $0x20] sm:$0xff]   ;;  %v2172_v22 = vld [vmem:[#allocation6 + $0x18] sm:$0xff]   ;;  %v2173_v23 = vld [vmem:[#allocation6 + $0x10] sm:$0xff]   ;;  %v1765_v28 = vcombine.low %v2776_v4, %v2779_v5  ;;  %v1769_v29 = vcombine.low %v2800_v12, %v2803_v13  ;;  %v1766_v30 = vcombine.low %v2782_v6, %v2785_v7 }
  0x8b   : > { %1886 = vmatpush3.bf16.msra.mxu0 %v2168_v16  ;;  %2021 = vmatpush3.bf16.msra.mxu1 %v2168_v16  ;;  %v2174_v24 = vld [vmem:[#allocation6 + $0x8] sm:$0xff]   ;;  %v2175_v25 = vld [vmem:[#allocation6] sm:$0xff]   ;;  %v1770_v31 = vcombine.low %v2806_v14, %v2809_v15 }
  0x8c   : > { %1887 = vmatprep.subr.bf16.mxu0 %v2169_v17  ;;  %2014 = vmatprep.subr.bf16.mxu1 %v2169_v17  ;;  %v1762_v32 = vld [vmem:[%s3106_s11] ss:$0 sm:$0xff] }
  0x8d   : > { %1901 = vmatprep.mubr.bf16.mxu0 %v1763_v18  ;;  %1909 = vmatprep.mubr.bf16.mxu1 %v1767_v19 }
  0x8f   : > { %1888 = vmatpush3.bf16.msra.mxu0 %v2169_v17  ;;  %2022 = vmatpush3.bf16.msra.mxu1 %v2169_v17 }
  0x90   : > { %1889 = vmatprep.subr.bf16.mxu0 %v2170_v20  ;;  %2015 = vmatprep.subr.bf16.mxu1 %v2170_v20 }
  0x93   : > { %1890 = vmatpush3.bf16.msra.mxu0 %v2170_v20  ;;  %2023 = vmatpush3.bf16.msra.mxu1 %v2170_v20 }
  0x94   : > { %1891 = vmatprep.subr.bf16.mxu0 %v2171_v21  ;;  %2016 = vmatprep.subr.bf16.mxu1 %v2171_v21 }
  0x97   : > { %1892 = vmatpush3.bf16.msra.mxu0 %v2171_v21  ;;  %2024 = vmatpush3.bf16.msra.mxu1 %v2171_v21 }
  0x98   : > { %1893 = vmatprep.subr.bf16.mxu0 %v2172_v22  ;;  %2017 = vmatprep.subr.bf16.mxu1 %v2172_v22 }
  0x9b   : > { %1894 = vmatpush3.bf16.msra.mxu0 %v2172_v22  ;;  %2025 = vmatpush3.bf16.msra.mxu1 %v2172_v22 }
  0x9c   : > { %1895 = vmatprep.subr.bf16.mxu0 %v2173_v23  ;;  %2018 = vmatprep.subr.bf16.mxu1 %v2173_v23 }
  0x9f   : > { %1896 = vmatpush3.bf16.msra.mxu0 %v2173_v23  ;;  %2026 = vmatpush3.bf16.msra.mxu1 %v2173_v23 }
  0xa0   : > { %1897 = vmatprep.subr.bf16.mxu0 %v2174_v24  ;;  %2019 = vmatprep.subr.bf16.mxu1 %v2174_v24 }
  0xa3   : > { %1898 = vmatpush3.bf16.msra.mxu0 %v2174_v24  ;;  %2027 = vmatpush3.bf16.msra.mxu1 %v2174_v24 }
  0xa4   : > { %1899 = vmatprep.subr.bf16.mxu0 %v2175_v25  ;;  %2020 = vmatprep.subr.bf16.mxu1 %v2175_v25 }
  0xa7   : > { %1900 = vmatpush3.bf16.msra.mxu0 %v2175_v25  ;;  %2028 = vmatpush3.bf16.msra.mxu1 %v2175_v25 }
  0xaa   : > { %1902 = vmatmul.mubr.bf16.vlgmr.msra.gmra.mxu0 %v1764_v26  ;;  %1910 = vmatmul.mubr.bf16.vlgmr.msra.gmra.mxu1 %v1768_v27 }
  0xab   : > { %1905 = vmatprep.mubr.bf16.mxu0 %v1765_v28  ;;  %1913 = vmatprep.mubr.bf16.mxu1 %v1769_v29 }
  0xb2   : > { %1906 = vmatmul.mubr.bf16.gmra.mxu0 %v1766_v30  ;;  %1914 = vmatmul.mubr.bf16.gmra.mxu1 %v1770_v31 }
 0x16a   : > { %v1903_v33 = vpop.f32.mrf.mxu0  ;;  %v1911_v34 = vpop.f32.mrf.mxu1 }
 0x16b   : > { %v732_v35 = vadd.f32 %v1903_v33, %v1762_v32  ;;  %v764_v36 = vadd.f32 %v1911_v34, %v1762_v32 }
 0x16c   : > { %v723_v37 = vpop.f32.mrf.mxu0  ;;  %v755_v38 = vpop.f32.mrf.mxu1 }
 0x16d   : > { %788 = vst [vmem:[#allocation2 + $0x58] sm:$0xff] %v732_v35  ;;  %796 = vst [vmem:[#allocation2 + $0x10] sm:$0xff] %v764_v36  ;;  %v724_v39 = vadd.f32 %v1762_v32, %v723_v37  ;;  %v756_v40 = vadd.f32 %v1762_v32, %v755_v38 }
 0x16e   : > { %v1904_v41 = vpop.f32.mrf.mxu0  ;;  %v1912_v42 = vpop.f32.mrf.mxu1 }
 0x16f   : > { %786 = vst [vmem:[#allocation2 + $0x30] sm:$0xff] %v724_v39  ;;  %794 = vst [vmem:[#allocation2 + $0x40] sm:$0xff] %v756_v40  ;;  %v735_v43 = vadd.f32 %v1904_v41, %v1762_v32  ;;  %v767_v44 = vadd.f32 %v1912_v42, %v1762_v32 }
 0x170   : > { %v726_v45 = vpop.f32.mrf.mxu0  ;;  %v758_v46 = vpop.f32.mrf.mxu1 }
 0x171   : > { %789 = vst [vmem:[#allocation2 + $0x18] sm:$0xff] %v735_v43  ;;  %797 = vst [vmem:[#allocation2 + $0x38] sm:$0xff] %v767_v44  ;;  %v727_v47 = vadd.f32 %v1762_v32, %v726_v45  ;;  %v759_v48 = vadd.f32 %v1762_v32, %v758_v46 }
 0x172   : > { %v1907_v49 = vpop.f32.mrf.mxu0  ;;  %v1915_v50 = vpop.f32.mrf.mxu1 }
 0x173   : > { %787 = vst [vmem:[#allocation2] sm:$0xff] %v727_v47  ;;  %795 = vst [vmem:[#allocation2 + $0x20] sm:$0xff] %v759_v48  ;;  %v748_v51 = vadd.f32 %v1907_v49, %v1762_v32  ;;  %v780_v52 = vadd.f32 %v1915_v50, %v1762_v32 }
 0x174   : > { %v739_v53 = vpop.f32.mrf.mxu0  ;;  %v771_v54 = vpop.f32.mrf.mxu1 }
 0x175   : > { %792 = vst [vmem:[#allocation2 + $0x8] sm:$0xff] %v748_v51  ;;  %800 = vst [vmem:[#allocation2 + $0x78] sm:$0xff] %v780_v52  ;;  %v740_v55 = vadd.f32 %v1762_v32, %v739_v53  ;;  %v772_v56 = vadd.f32 %v1762_v32, %v771_v54 }
 0x176   : > { %v1908_v57 = vpop.f32.mrf.mxu0  ;;  %v1916_v58 = vpop.f32.mrf.mxu1 }
 0x177   : > { %790 = vst [vmem:[#allocation2 + $0x50] sm:$0xff] %v740_v55  ;;  %798 = vst [vmem:[#allocation2 + $0x60] sm:$0xff] %v772_v56  ;;  %v751_v59 = vadd.f32 %v1908_v57, %v1762_v32  ;;  %v783_v60 = vadd.f32 %v1916_v58, %v1762_v32 }
 0x178   : > { %v742_v61 = vpop.f32.mrf.mxu0  ;;  %v774_v62 = vpop.f32.mrf.mxu1 }
 0x179   : > { %793 = vst [vmem:[#allocation2 + $0x48] sm:$0xff] %v751_v59  ;;  %801 = vst [vmem:[#allocation2 + $0x28] sm:$0xff] %v783_v60  ;;  %v743_v63 = vadd.f32 %v1762_v32, %v742_v61  ;;  %v775_v16 = vadd.f32 %v1762_v32, %v774_v62 }
 0x17b   : > { %791 = vst [vmem:[#allocation2 + $0x68] sm:$0xff] %v743_v63  ;;  %799 = vst [vmem:[#allocation2 + $0x70] sm:$0xff] %v775_v16 }
 0x17c PF: > { %v2176_v17 = vld [vmem:[%s2811_s27 + $0x38] sm:$0xff]   ;;  %v1779_v18 = vcombine.low %v2759_v0, %v2762_v1  ;;  %v2178_v20 = vld [vmem:[%s2811_s27 + $0x30] sm:$0xff]   ;;  %v2180_v22 = vld [vmem:[%s2811_s27 + $0x28] sm:$0xff]   ;;  %v1780_v40 = vcombine.low %v2765_v2, %v2773_v3  ;;  %v1781_v42 = vcombine.low %v2776_v4, %v2779_v5  ;;  %v1782_v46 = vcombine.low %v2782_v6, %v2785_v7  ;;  %p1813_p6 = scmp.ne.s32.totalorder %s2420_s21, 1 }
 0x17d   : > { %v2177_v19 = vld [vmem:[%s2739_s30 + $0x38] sm:$0xff]   ;;  %1917 = vmatprep.subr.bf16.mxu0 %v2176_v17  ;;  %v2179_v21 = vld [vmem:[%s2739_s30 + $0x30] sm:$0xff]   ;;  %v2181_v23 = vld [vmem:[%s2739_s30 + $0x28] sm:$0xff]   ;;  %v1783_v48 = vcombine.low %v2788_v8, %v2791_v9  ;;  %v1784_v9 = vcombine.low %v2794_v10, %v2797_v11  ;;  %v1785_v53 = vcombine.low %v2800_v12, %v2803_v13  ;;  %v1786_v11 = vcombine.low %v2806_v14, %v2809_v15  ;;  %s3107_s18 = sld [smem:[#allocation25_spill]] (!%p1813_p6) }
 0x17e   : > { %1933 = vmatprep.mubr.bf16.mxu0 %v1779_v18  ;;  %1949 = vmatprep.subr.bf16.mxu1 %v2177_v19  ;;  %v2182_v0 = vld [vmem:[%s2811_s27 + $0x20] sm:$0xff]   ;;  %v2184_v24 = vld [vmem:[%s2811_s27 + $0x18] sm:$0xff]   ;;  %v2186_v26 = vld [vmem:[%s2811_s27 + $0x10] sm:$0xff]   ;;  %s1534_s21 = sld [smem:[#allocation3]] (!%p1813_p6) }
 0x17f   : > { %1918 = vmatpush3.bf16.msra.mxu0 %v2176_v17  ;;  %1950 = vmatpush3.bf16.msra.mxu1 %v2177_v19  ;;  %v2183_v1 = vld [vmem:[%s2739_s30 + $0x20] sm:$0xff]   ;;  %v2185_v25 = vld [vmem:[%s2739_s30 + $0x18] sm:$0xff]   ;;  %v2848_v27 = vld [vmem:[#allocation2 + $0x30] sm:$0xff] }
 0x180   : > { %1919 = vmatprep.subr.bf16.mxu0 %v2178_v20  ;;  %1951 = vmatprep.subr.bf16.mxu1 %v2179_v21  ;;  %v2850_v28 = vld [vmem:[#allocation2] sm:$0xff]  ;;  %v2187_v29 = vld [vmem:[%s2739_s30 + $0x10] sm:$0xff]   ;;  %v2188_v31 = vld [vmem:[%s2811_s27 + $0x8] sm:$0xff]  }
 0x181   : > { %v818_v30 = vpack.c.bf16 %v2850_v28, %v2848_v27  ;;  %v2189_v32 = vld [vmem:[%s2739_s30 + $0x8] sm:$0xff]   ;;  %v2190_v33 = vld [vmem:[%s2811_s27] sm:$0xff]   ;;  %v2859_v35 = vld [vmem:[#allocation2 + $0x58] sm:$0xff] }
 0x182   : > { %v2191_v34 = vld [vmem:[%s2739_s30] sm:$0xff]   ;;  %v2861_v36 = vld [vmem:[#allocation2 + $0x18] sm:$0xff]  ;;  %v2864_v38 = vld [vmem:[#allocation2 + $0x50] sm:$0xff] }
 0x183   : > { %1920 = vmatpush3.bf16.msra.mxu0 %v2178_v20  ;;  %1952 = vmatpush3.bf16.msra.mxu1 %v2179_v21  ;;  %v2192_v37 = vld [vmem:[%s2813_s8 + $0x38] sm:$0xff]   ;;  %v2866_v39 = vld [vmem:[#allocation2 + $0x68] sm:$0xff]  ;;  %v819_v41 = vpack.c.bf16 %v2861_v36, %v2859_v35  ;;  %v2193_v44 = vld [vmem:[%s2813_s8 + $0x30] sm:$0xff]  }
 0x184   : > { %1921 = vmatprep.subr.bf16.mxu0 %v2180_v22  ;;  %1953 = vmatprep.subr.bf16.mxu1 %v2181_v23  ;;  %v820_v43 = vpack.c.bf16 %v2866_v39, %v2864_v38  ;;  %v2877_v2 = vld [vmem:[#allocation2 + $0x8] sm:$0xff]  ;;  %v2881_v45 = vld [vmem:[#allocation2 + $0x40] sm:$0xff]  ;;  %v2895_v6 = vld [vmem:[#allocation2 + $0x10] sm:$0xff] }
 0x185   : > { %1965 = vmatprep.mubr.bf16.mxu1 %v818_v30  ;;  %v2879_v3 = vld [vmem:[#allocation2 + $0x48] sm:$0xff]  ;;  %v2883_v4 = vld [vmem:[#allocation2 + $0x20] sm:$0xff]  ;;  %v2897_v7 = vld [vmem:[#allocation2 + $0x38] sm:$0xff] }
 0x186   : > { %v2194_v5 = vld [vmem:[%s2813_s8 + $0x28] sm:$0xff]   ;;  %v821_v47 = vpack.c.bf16 %v2879_v3, %v2877_v2  ;;  %v822_v49 = vpack.c.bf16 %v2883_v4, %v2881_v45  ;;  %v2195_v50 = vld [vmem:[%s2813_s8 + $0x20] sm:$0xff]   ;;  %v2901_v8 = vld [vmem:[#allocation2 + $0x70] sm:$0xff]  ;;  %v823_v52 = vpack.c.bf16 %v2897_v7, %v2895_v6 }
 0x187   : > { %1922 = vmatpush3.bf16.msra.mxu0 %v2180_v22  ;;  %1954 = vmatpush3.bf16.msra.mxu1 %v2181_v23  ;;  %v2899_v51 = vld [vmem:[#allocation2 + $0x60] sm:$0xff]  ;;  %v2911_v55 = vld [vmem:[#allocation2 + $0x78] sm:$0xff]  ;;  %v2913_v10 = vld [vmem:[#allocation2 + $0x28] sm:$0xff] }
 0x188   : > { %1923 = vmatprep.subr.bf16.mxu0 %v2182_v0  ;;  %1955 = vmatprep.subr.bf16.mxu1 %v2183_v1  ;;  %v824_v54 = vpack.c.bf16 %v2901_v8, %v2899_v51  ;;  %v825_v12 = vpack.c.bf16 %v2913_v10, %v2911_v55  ;;  %v2196_v13 = vld [vmem:[%s2813_s8 + $0x18] sm:$0xff]   ;;  %v2197_v56 = vld [vmem:[%s2813_s8 + $0x10] sm:$0xff]   ;;  %v2198_v57 = vld [vmem:[%s2813_s8 + $0x8] sm:$0xff]  }
 0x189   : > { %v2199_v14 = vld [vmem:[%s2813_s8] sm:$0xff]  }
 0x18a   : > { %v2928_v17 = vld [vmem:[%s539_s0] ss:$0 sm:$0xff] }
 0x18b   : > { %1924 = vmatpush3.bf16.msra.mxu0 %v2182_v0  ;;  %1956 = vmatpush3.bf16.msra.mxu1 %v2183_v1 }
 0x18c   : > { %1925 = vmatprep.subr.bf16.mxu0 %v2184_v24  ;;  %1957 = vmatprep.subr.bf16.mxu1 %v2185_v25 }
 0x18f   : > { %1926 = vmatpush3.bf16.msra.mxu0 %v2184_v24  ;;  %1958 = vmatpush3.bf16.msra.mxu1 %v2185_v25 }
 0x190   : > { %1927 = vmatprep.subr.bf16.mxu0 %v2186_v26  ;;  %1959 = vmatprep.subr.bf16.mxu1 %v2187_v29 }
 0x193   : > { %1928 = vmatpush3.bf16.msra.mxu0 %v2186_v26  ;;  %1960 = vmatpush3.bf16.msra.mxu1 %v2187_v29 }
 0x194   : > { %1929 = vmatprep.subr.bf16.mxu0 %v2188_v31  ;;  %1961 = vmatprep.subr.bf16.mxu1 %v2189_v32 }
 0x197   : > { %1930 = vmatpush3.bf16.msra.mxu0 %v2188_v31  ;;  %1962 = vmatpush3.bf16.msra.mxu1 %v2189_v32 }
 0x198   : > { %1931 = vmatprep.subr.bf16.mxu0 %v2190_v33  ;;  %1963 = vmatprep.subr.bf16.mxu1 %v2191_v34 }
 0x19b   : > { %1932 = vmatpush3.bf16.msra.mxu0 %v2190_v33  ;;  %1964 = vmatpush3.bf16.msra.mxu1 %v2191_v34 }
 0x19c   : > { %1981 = vmatprep.subr.bf16.mxu0 %v2192_v37  ;;  %2029 = vmatprep.subr.bf16.mxu1 %v2192_v37 }
 0x19e   : > { %1934 = vmatmul.mubr.bf16.vlgmr.msra.gmra.mxu0 %v1780_v40  ;;  %1966 = vmatmul.mubr.bf16.vlgmr.msra.gmra.mxu1 %v819_v41 }
 0x19f   : > { %1937 = vmatprep.mubr.bf16.mxu0 %v1781_v42  ;;  %1969 = vmatprep.mubr.bf16.mxu1 %v820_v43 }
 0x1a0   : > { %1982 = vmatpush3.bf16.msra.mxu0 %v2192_v37  ;;  %2037 = vmatpush3.bf16.msra.mxu1 %v2192_v37 }
 0x1a1   : > { %1983 = vmatprep.subr.bf16.mxu0 %v2193_v44  ;;  %2030 = vmatprep.subr.bf16.mxu1 %v2193_v44 }
 0x1a4   : > { %1984 = vmatpush3.bf16.msra.mxu0 %v2193_v44  ;;  %2038 = vmatpush3.bf16.msra.mxu1 %v2193_v44 }
 0x1a5   : > { %1985 = vmatprep.subr.bf16.mxu0 %v2194_v5  ;;  %2031 = vmatprep.subr.bf16.mxu1 %v2194_v5 }
 0x1a6   : > { %1938 = vmatmul.mubr.bf16.gmra.mxu0 %v1782_v46  ;;  %1970 = vmatmul.mubr.bf16.gmra.mxu1 %v821_v47 }
 0x1a7   : > { %1941 = vmatprep.mubr.bf16.mxu0 %v1783_v48  ;;  %1973 = vmatprep.mubr.bf16.mxu1 %v822_v49 }
 0x1a8   : > { %1986 = vmatpush3.bf16.msra.mxu0 %v2194_v5  ;;  %2039 = vmatpush3.bf16.msra.mxu1 %v2194_v5 }
 0x1a9   : > { %1987 = vmatprep.subr.bf16.mxu0 %v2195_v50  ;;  %2032 = vmatprep.subr.bf16.mxu1 %v2195_v50 }
 0x1ac   : > { %1988 = vmatpush3.bf16.msra.mxu0 %v2195_v50  ;;  %2040 = vmatpush3.bf16.msra.mxu1 %v2195_v50 }
 0x1ad   : > { %1989 = vmatprep.subr.bf16.mxu0 %v2196_v13  ;;  %2033 = vmatprep.subr.bf16.mxu1 %v2196_v13 }
 0x1ae   : > { %1942 = vmatmul.mubr.bf16.gmra.mxu0 %v1784_v9  ;;  %1974 = vmatmul.mubr.bf16.gmra.mxu1 %v823_v52 }
 0x1af   : > { %1945 = vmatprep.mubr.bf16.mxu0 %v1785_v53  ;;  %1977 = vmatprep.mubr.bf16.mxu1 %v824_v54 }
 0x1b0   : > { %1990 = vmatpush3.bf16.msra.mxu0 %v2196_v13  ;;  %2041 = vmatpush3.bf16.msra.mxu1 %v2196_v13 }
 0x1b1   : > { %1991 = vmatprep.subr.bf16.mxu0 %v2197_v56  ;;  %2034 = vmatprep.subr.bf16.mxu1 %v2197_v56 }
 0x1b4   : > { %1992 = vmatpush3.bf16.msra.mxu0 %v2197_v56  ;;  %2042 = vmatpush3.bf16.msra.mxu1 %v2197_v56 }
 0x1b5   : > { %1993 = vmatprep.subr.bf16.mxu0 %v2198_v57  ;;  %2035 = vmatprep.subr.bf16.mxu1 %v2198_v57 }
 0x1b6   : > { %1946 = vmatmul.mubr.bf16.gmra.mxu0 %v1786_v11  ;;  %1978 = vmatmul.mubr.bf16.gmra.mxu1 %v825_v12 }
 0x1b8   : > { %1994 = vmatpush3.bf16.msra.mxu0 %v2198_v57  ;;  %2043 = vmatpush3.bf16.msra.mxu1 %v2198_v57 }
 0x1b9   : > { %1995 = vmatprep.subr.bf16.mxu0 %v2199_v14  ;;  %2036 = vmatprep.subr.bf16.mxu1 %v2199_v14 }
 0x1bc   : > { %1996 = vmatpush3.bf16.msra.mxu0 %v2199_v14  ;;  %2044 = vmatpush3.bf16.msra.mxu1 %v2199_v14 }
 0x25e   : > { %v1935_v15 = vpop.f32.mrf.mxu0  ;;  %v1967_v58 = vpop.f32.mrf.mxu1 }
 0x25f   : > { %v1142_v63 = vadd.f32 %v1967_v58, %v1935_v15 }
 0x260   : > { %v988_v59 = vpop.f32.mrf.mxu0  ;;  %v1133_v60 = vpop.f32.mrf.mxu1 }
 0x261   : > { %v1134_v61 = vadd.f32 %v1133_v60, %v988_v59  ;;  %v1205_v1 = vadd.f32 %v2928_v17, %v1142_v63 }
 0x262   : > { %v1936_v62 = vpop.f32.mrf.mxu0  ;;  %v1968_v16 = vpop.f32.mrf.mxu1 }
 0x263   : > { %v1145_v18 = vadd.f32 %v1968_v16, %v1936_v62  ;;  %v1203_v21 = vadd.f32 %v2928_v17, %v1134_v61  ;;  %v1221_v37 = vmax.f32 %v1205_v1, 0.0 }
 0x264   : > { %v991_v19 = vpop.f32.mrf.mxu0  ;;  %v1136_v20 = vpop.f32.mrf.mxu1 }
 0x265   : > { %v1206_v22 = vadd.f32 %v2928_v17, %v1145_v18  ;;  %v1137_v23 = vadd.f32 %v1136_v20, %v991_v19  ;;  %v1219_v31 = vmax.f32 %v1203_v21, 0.0 }
 0x266   : > { %v1939_v0 = vpop.f32.mrf.mxu0  ;;  %v1971_v24 = vpop.f32.mrf.mxu1 }
 0x267   : > { %v1204_v25 = vadd.f32 %v2928_v17, %v1137_v23  ;;  %v1222_v29 = vmax.f32 %v1206_v22, 0.0  ;;  %v1158_v40 = vadd.f32 %v1971_v24, %v1939_v0 }
 0x268   : > { %v1004_v26 = vpop.f32.mrf.mxu0  ;;  %v1149_v30 = vpop.f32.mrf.mxu1 }
 0x269   : > { %v1220_v32 = vmax.f32 %v1204_v25, 0.0  ;;  %v1150_v33 = vadd.f32 %v1149_v30, %v1004_v26  ;;  %v1236_v5 = vpack.c.bf16 %v1222_v29, %v1221_v37  ;;  %v1209_v9 = vadd.f32 %v2928_v17, %v1158_v40 }
 0x26a   : > { %v1940_v34 = vpop.f32.mrf.mxu0  ;;  %v1972_v41 = vpop.f32.mrf.mxu1 }
 0x26b   : > { %v1161_v42 = vadd.f32 %v1972_v41, %v1940_v34  ;;  %v1235_v44 = vpack.c.bf16 %v1220_v32, %v1219_v31  ;;  %v1207_v47 = vadd.f32 %v2928_v17, %v1150_v33  ;;  %v1225_v15 = vmax.f32 %v1209_v9, 0.0 }
 0x26c   : > { %v1007_v43 = vpop.f32.mrf.mxu0  ;;  %v1152_v46 = vpop.f32.mrf.mxu1 }
 0x26d   : > { %v1210_v48 = vadd.f32 %v2928_v17, %v1161_v42  ;;  %v1153_v49 = vadd.f32 %v1152_v46, %v1007_v43  ;;  %1997 = vmatprep.mubr.bf16.mxu0 %v1235_v44  ;;  %v1223_v13 = vmax.f32 %v1207_v47, 0.0 }
 0x26e   : > { %v1943_v50 = vpop.f32.mrf.mxu0  ;;  %v1975_v52 = vpop.f32.mrf.mxu1  ;;  %1998 = vmatmul.mubr.bf16.vlgmr.msra.gmra.mxu0 %v1236_v5 }
 0x26f   : > { %v1208_v53 = vadd.f32 %v2928_v17, %v1153_v49  ;;  %v1226_v11 = vmax.f32 %v1210_v48, 0.0  ;;  %v1174_v58 = vadd.f32 %v1975_v52, %v1943_v50 }
 0x270   : > { %v1020_v54 = vpop.f32.mrf.mxu0  ;;  %v1165_v12 = vpop.f32.mrf.mxu1 }
 0x271   : > { %v1224_v56 = vmax.f32 %v1208_v53, 0.0  ;;  %v1166_v57 = vadd.f32 %v1165_v12, %v1020_v54  ;;  %v1238_v16 = vpack.c.bf16 %v1226_v11, %v1225_v15  ;;  %v1213_v22 = vadd.f32 %v2928_v17, %v1174_v58  ;;  %v2951_v11 = vld [vmem:[%s542_s12] ss:$0 sm:$0xff] }
 0x272   : > { %v1944_v14 = vpop.f32.mrf.mxu0  ;;  %v1976_v59 = vpop.f32.mrf.mxu1 }
 0x273   : > { %v1177_v60 = vadd.f32 %v1976_v59, %v1944_v14  ;;  %v1237_v62 = vpack.c.bf16 %v1224_v56, %v1223_v13  ;;  %v1211_v18 = vadd.f32 %v2928_v17, %v1166_v57  ;;  %v1229_v32 = vmax.f32 %v1213_v22, 0.0 }
 0x274   : > { %v1023_v61 = vpop.f32.mrf.mxu0  ;;  %v1168_v63 = vpop.f32.mrf.mxu1 }
 0x275   : > { %v1214_v19 = vadd.f32 %v2928_v17, %v1177_v60  ;;  %v1169_v20 = vadd.f32 %v1168_v63, %v1023_v61  ;;  %2001 = vmatprep.mubr.bf16.mxu0 %v1237_v62  ;;  %v1227_v26 = vmax.f32 %v1211_v18, 0.0 }
 0x276   : > { %v1947_v21 = vpop.f32.mrf.mxu0  ;;  %v1979_v23 = vpop.f32.mrf.mxu1  ;;  %2002 = vmatmul.mubr.bf16.gmra.mxu0 %v1238_v16 }
 0x277   : > { %v1212_v0 = vadd.f32 %v2928_v17, %v1169_v20  ;;  %v1230_v24 = vmax.f32 %v1214_v19, 0.0  ;;  %v1190_v33 = vadd.f32 %v1979_v23, %v1947_v21 }
 0x278   : > { %v1036_v1 = vpop.f32.mrf.mxu0  ;;  %v1181_v25 = vpop.f32.mrf.mxu1 }
 0x279   : > { %v1228_v29 = vmax.f32 %v1212_v0, 0.0  ;;  %v1182_v30 = vadd.f32 %v1181_v25, %v1036_v1  ;;  %v1240_v42 = vpack.c.bf16 %v1230_v24, %v1229_v32  ;;  %v1217_v47 = vadd.f32 %v2928_v17, %v1190_v33 }
 0x27a   : > { %v1948_v31 = vpop.f32.mrf.mxu0  ;;  %v1980_v34 = vpop.f32.mrf.mxu1 }
 0x27b   : > { %v1193_v37 = vadd.f32 %v1980_v34, %v1948_v31  ;;  %v1239_v41 = vpack.c.bf16 %v1228_v29, %v1227_v26  ;;  %v1215_v44 = vadd.f32 %v2928_v17, %v1182_v30  ;;  %v1233_v52 = vmax.f32 %v1217_v47, 0.0 }
 0x27c   : > { %v1039_v40 = vpop.f32.mrf.mxu0  ;;  %v1184_v43 = vpop.f32.mrf.mxu1 }
 0x27d   : > { %v1218_v5 = vadd.f32 %v2928_v17, %v1193_v37  ;;  %v1185_v46 = vadd.f32 %v1184_v43, %v1039_v40  ;;  %2005 = vmatprep.mubr.bf16.mxu1 %v1239_v41  ;;  %v1231_v50 = vmax.f32 %v1215_v44, 0.0 }
 0x27e   : > { %2006 = vmatmul.mubr.bf16.vlgmr.msra.gmra.mxu1 %v1240_v42 }
 0x27f   : > { %v1216_v48 = vadd.f32 %v2928_v17, %v1185_v46  ;;  %v1234_v49 = vmax.f32 %v1218_v5, 0.0 }
 0x281   : > { %v1232_v9 = vmax.f32 %v1216_v48, 0.0  ;;  %v1242_v54 = vpack.c.bf16 %v1234_v49, %v1233_v52 }
 0x283   : > { %v1241_v53 = vpack.c.bf16 %v1232_v9, %v1231_v50 }
 0x285   : > { %2009 = vmatprep.mubr.bf16.mxu1 %v1241_v53 }
 0x286   : > { %2010 = vmatmul.mubr.bf16.gmra.mxu1 %v1242_v54 }
 0x32e   : > { %v1999_v12 = vpop.f32.mrf.mxu0 }
 0x32f   : > { %v1357_v13 = vadd.f32 %v1999_v12, %v2951_v11 }
 0x330   : > { %v1348_v56 = vpop.f32.mrf.mxu0 }
 0x331   : > { %v1413_v57 = vmax.f32 %v1357_v13, 0.0  ;;  %v1349_v17 = vadd.f32 %v2951_v11, %v1348_v56 }
 0x332   : > { %v2000_v14 = vpop.f32.mrf.mxu0 }
 0x333   : > { %v1429_v15 = vadd.f32 %v1413_v57, %v2859_v35  ;;  %v1411_v58 = vmax.f32 %v1349_v17, 0.0  ;;  %v1360_v59 = vadd.f32 %v2000_v14, %v2951_v11 }
 0x334   : > { %v1351_v60 = vpop.f32.mrf.mxu0 }
 0x335   : > { %1445 = vst [vmem:[#allocation2 + $0x58] sm:$0xff] %v1429_v15  ;;  %v1427_v61 = vadd.f32 %v1411_v58, %v2848_v27  ;;  %v1414_v62 = vmax.f32 %v1360_v59, 0.0  ;;  %v1352_v63 = vadd.f32 %v2951_v11, %v1351_v60 }
 0x336   : > { %v2003_v16 = vpop.f32.mrf.mxu0 }
 0x337   : > { %1443 = vst [vmem:[#allocation2 + $0x30] sm:$0xff] %v1427_v61  ;;  %v1430_v18 = vadd.f32 %v1414_v62, %v2861_v36  ;;  %v1412_v19 = vmax.f32 %v1352_v63, 0.0  ;;  %v1373_v20 = vadd.f32 %v2003_v16, %v2951_v11 }
 0x338   : > { %v1364_v21 = vpop.f32.mrf.mxu0 }
 0x339   : > { %1446 = vst [vmem:[#allocation2 + $0x18] sm:$0xff] %v1430_v18  ;;  %v1428_v35 = vadd.f32 %v1412_v19, %v2850_v28  ;;  %v1417_v22 = vmax.f32 %v1373_v20, 0.0  ;;  %v1365_v23 = vadd.f32 %v2951_v11, %v1364_v21 }
 0x33a   : > { %v2004_v0 = vpop.f32.mrf.mxu0 }
 0x33b   : > { %1444 = vst [vmem:[#allocation2] sm:$0xff] %v1428_v35  ;;  %v1433_v27 = vadd.f32 %v1417_v22, %v2877_v2  ;;  %v1415_v1 = vmax.f32 %v1365_v23, 0.0  ;;  %v1376_v24 = vadd.f32 %v2004_v0, %v2951_v11 }
 0x33c   : > { %v1367_v25 = vpop.f32.mrf.mxu0 }
 0x33d   : > { %1449 = vst [vmem:[#allocation2 + $0x8] sm:$0xff] %v1433_v27  ;;  %v1431_v36 = vadd.f32 %v1415_v1, %v2864_v38  ;;  %v1418_v26 = vmax.f32 %v1376_v24, 0.0  ;;  %v1368_v29 = vadd.f32 %v2951_v11, %v1367_v25 }
 0x33e   : > { %v2007_v30 = vpop.f32.mrf.mxu1 }
 0x33f   : > { %1447 = vst [vmem:[#allocation2 + $0x50] sm:$0xff] %v1431_v36  ;;  %v1434_v28 = vadd.f32 %v1418_v26, %v2879_v3  ;;  %v1416_v31 = vmax.f32 %v1368_v29, 0.0  ;;  %v1389_v32 = vadd.f32 %v2007_v30, %v2951_v11 }
 0x340   : > { %v1380_v33 = vpop.f32.mrf.mxu1 }
 0x341   : > { %1450 = vst [vmem:[#allocation2 + $0x48] sm:$0xff] %v1434_v28  ;;  %v1432_v2 = vadd.f32 %v1416_v31, %v2866_v39  ;;  %v1421_v34 = vmax.f32 %v1389_v32, 0.0  ;;  %v1381_v37 = vadd.f32 %v2951_v11, %v1380_v33 }
 0x342   : > { %v2008_v40 = vpop.f32.mrf.mxu1 }
 0x343   : > { %1448 = vst [vmem:[#allocation2 + $0x68] sm:$0xff] %v1432_v2  ;;  %v1437_v38 = vadd.f32 %v1421_v34, %v2895_v6  ;;  %v1419_v41 = vmax.f32 %v1381_v37, 0.0  ;;  %v1392_v42 = vadd.f32 %v2008_v40, %v2951_v11 }
 0x344   : > { %v1383_v43 = vpop.f32.mrf.mxu1 }
 0x345   : > { %1453 = vst [vmem:[#allocation2 + $0x10] sm:$0xff] %v1437_v38  ;;  %v1435_v3 = vadd.f32 %v1419_v41, %v2881_v45  ;;  %v1422_v44 = vmax.f32 %v1392_v42, 0.0  ;;  %v1384_v5 = vadd.f32 %v2951_v11, %v1383_v43 }
 0x346   : > { %v2011_v46 = vpop.f32.mrf.mxu1 }
 0x347   : > { %1451 = vst [vmem:[#allocation2 + $0x40] sm:$0xff] %v1435_v3  ;;  %v1438_v39 = vadd.f32 %v1422_v44, %v2897_v7  ;;  %v1420_v47 = vmax.f32 %v1384_v5, 0.0  ;;  %v1405_v48 = vadd.f32 %v2011_v46, %v2951_v11 }
 0x348   : > { %v1396_v49 = vpop.f32.mrf.mxu1 }
 0x349   : > { %1454 = vst [vmem:[#allocation2 + $0x38] sm:$0xff] %v1438_v39  ;;  %v1436_v6 = vadd.f32 %v1420_v47, %v2883_v4  ;;  %v1425_v50 = vmax.f32 %v1405_v48, 0.0  ;;  %v1397_v9 = vadd.f32 %v2951_v11, %v1396_v49 }
 0x34a   : > { %v2012_v52 = vpop.f32.mrf.mxu1 }
 0x34b   : > { %1452 = vst [vmem:[#allocation2 + $0x20] sm:$0xff] %v1436_v6  ;;  %v1441_v45 = vadd.f32 %v1425_v50, %v2911_v55  ;;  %v1423_v53 = vmax.f32 %v1397_v9, 0.0  ;;  %v1408_v54 = vadd.f32 %v2012_v52, %v2951_v11 }
 0x34c   : > { %v1399_v12 = vpop.f32.mrf.mxu1 }
 0x34d   : > { %1457 = vst [vmem:[#allocation2 + $0x78] sm:$0xff] %v1441_v45  ;;  %v1439_v7 = vadd.f32 %v1423_v53, %v2899_v51  ;;  %v1426_v13 = vmax.f32 %v1408_v54, 0.0  ;;  %v1400_v56 = vadd.f32 %v2951_v11, %v1399_v12 }
 0x34f   : > { %1455 = vst [vmem:[#allocation2 + $0x60] sm:$0xff] %v1439_v7  ;;  %v1442_v4 = vadd.f32 %v1426_v13, %v2913_v10  ;;  %v1424_v57 = vmax.f32 %v1400_v56, 0.0  ;;  %1462 = sbr.rel (%p1813_p6) target bundleno = 1024 (0x400), region = 88 }
 0x351   : > { %1458 = vst [vmem:[#allocation2 + $0x28] sm:$0xff] %v1442_v4  ;;  %v1440_v17 = vadd.f32 %v1424_v57, %v2901_v8 }
 0x353   : > { %1456 = vst [vmem:[#allocation2 + $0x70] sm:$0xff] %v1440_v17 }
 0x354   : > { %v1465_v55 = vld [vmem:[#allocation2 + $0x58] sm:$0xff]  ;;  %v1814_v14 = vld [vmem:[%s3107_s18] ss:$0 sm:$0xff]  ;;  %v1463_v51 = vld [vmem:[#allocation2 + $0x30] sm:$0xff]  ;;  %v1535_v33 = vstv %s1534_s21  ;;  %vm1552_vm0 = vcmask 7168  }
 0x355   : > { %v1488_v15 = vmul.f32 %v1814_v14, %v1465_v55  ;;  %v1486_v58 = vmul.f32 %v1814_v14, %v1463_v51  ;;  %v1466_v11 = vld [vmem:[#allocation2 + $0x18] sm:$0xff]  ;;  %v1464_v59 = vld [vmem:[#allocation2] sm:$0xff]  ;;  %v1468_v61 = vld [vmem:[#allocation2 + $0x68] sm:$0xff] }
 0x356   : > { %v1489_v10 = vmul.f32 %v1814_v14, %v1466_v11  ;;  %v1487_v60 = vmul.f32 %v1814_v14, %v1464_v59  ;;  %v1467_v8 = vld [vmem:[#allocation2 + $0x50] sm:$0xff]  ;;  %v1491_v62 = vmul.f32 %v1814_v14, %v1468_v61  ;;  %v1470_v16 = vld [vmem:[#allocation2 + $0x48] sm:$0xff]  ;;  %v1472_v21 = vld [vmem:[#allocation2 + $0x20] sm:$0xff] }
 0x357   : > { %1506 = vadd.xlane.f32.xlu1 %v1488_v15  ;;  %1502 = vadd.xlane.f32.xlu0 %v1486_v58  ;;  %v1490_v63 = vmul.f32 %v1814_v14, %v1467_v8  ;;  %v1469_v18 = vld [vmem:[#allocation2 + $0x8] sm:$0xff]  ;;  %v1493_v19 = vmul.f32 %v1814_v14, %v1470_v16  ;;  %v1471_v35 = vld [vmem:[#allocation2 + $0x40] sm:$0xff]  ;;  %v1495_v22 = vmul.f32 %v1814_v14, %v1472_v21  ;;  %v1474_v0 = vld [vmem:[#allocation2 + $0x38] sm:$0xff] }
 0x358   : > { %v1492_v20 = vmul.f32 %v1814_v14, %v1469_v18  ;;  %v1494_v23 = vmul.f32 %v1814_v14, %v1471_v35  ;;  %v1473_v27 = vld [vmem:[#allocation2 + $0x10] sm:$0xff]  ;;  %v1497_v1 = vmul.f32 %v1814_v14, %v1474_v0  ;;  %v1475_v36 = vld [vmem:[#allocation2 + $0x60] sm:$0xff]  ;;  %v1478_v30 = vld [vmem:[#allocation2 + $0x28] sm:$0xff] }
 0x359   : > { %v1496_v24 = vmul.f32 %v1814_v14, %v1473_v27  ;;  %v1498_v29 = vmul.f32 %v1814_v14, %v1475_v36  ;;  %v1477_v28 = vld [vmem:[#allocation2 + $0x78] sm:$0xff]  ;;  %v1501_v31 = vmul.f32 %v1814_v14, %v1478_v30 }
 0x35a   : > { %v1476_v25 = vld [vmem:[#allocation2 + $0x70] sm:$0xff]  ;;  %v1500_v32 = vmul.f32 %v1814_v14, %v1477_v28 }
 0x35b   : > { %1508 = vadd.xlane.f32.xlu1 %v1489_v10  ;;  %1504 = vadd.xlane.f32.xlu0 %v1487_v60  ;;  %v1499_v26 = vmul.f32 %v1814_v14, %v1476_v25 }
 0x35f   : > { %1512 = vadd.xlane.f32.xlu1 %v1491_v62  ;;  %1510 = vadd.xlane.f32.xlu0 %v1490_v63 }
 0x363   : > { %1516 = vadd.xlane.f32.xlu1 %v1493_v19  ;;  %1514 = vadd.xlane.f32.xlu0 %v1492_v20 }
 0x367   : > { %1520 = vadd.xlane.f32.xlu1 %v1495_v22  ;;  %1518 = vadd.xlane.f32.xlu0 %v1494_v23 }
 0x36b   : > { %1524 = vadd.xlane.f32.xlu1 %v1497_v1  ;;  %1522 = vadd.xlane.f32.xlu0 %v1496_v24 }
 0x36f   : > { %1528 = vadd.xlane.f32.xlu1 %v1499_v26  ;;  %1526 = vadd.xlane.f32.xlu0 %v1498_v29 }
 0x373   : > { %1532 = vadd.xlane.f32.xlu1 %v1501_v31  ;;  %1530 = vadd.xlane.f32.xlu0 %v1500_v32 }
 0x3e0   : > { %v1507_v2 = vpop.xlane.xlu1 %1506  ;;  %v1503_v34 = vpop.xlane.xlu0 %1502 }
 0x3e1   : > { %v1538_v37 = vadd.f32 %v1535_v33, %v1507_v2  ;;  %v1536_v40 = vadd.f32 %v1535_v33, %v1503_v34 }
 0x3e3   : > { %1555 = vst.msk [vmem:[%s2770_s26 + $0x10] sm:$0xff] %vm1552_vm0, %v1538_v37  ;;  %1553 = vst.msk [vmem:[%s2770_s26] sm:$0xff] %vm1552_vm0, %v1536_v40 }
 0x3e4   : > { %v1509_v38 = vpop.xlane.xlu1 %1508  ;;  %v1505_v41 = vpop.xlane.xlu0 %1504 }
 0x3e5   : > { %v1539_v42 = vadd.f32 %v1535_v33, %v1509_v38  ;;  %v1537_v43 = vadd.f32 %v1535_v33, %v1505_v41 }
 0x3e7   : > { %1556 = vst.msk [vmem:[%s2770_s26 + $0x18] sm:$0xff] %vm1552_vm0, %v1539_v42  ;;  %1554 = vst.msk [vmem:[%s2770_s26 + $0x8] sm:$0xff] %vm1552_vm0, %v1537_v43 }
 0x3e8   : > { %v1513_v3 = vpop.xlane.xlu1 %1512  ;;  %v1511_v44 = vpop.xlane.xlu0 %1510 }
 0x3e9   : > { %v1541_v5 = vadd.f32 %v1535_v33, %v1513_v3  ;;  %v1540_v46 = vadd.f32 %v1535_v33, %v1511_v44 }
 0x3eb   : > { %1558 = vst.msk [vmem:[%s2770_s26 + $0x28] sm:$0xff] %vm1552_vm0, %v1541_v5  ;;  %1557 = vst.msk [vmem:[%s2770_s26 + $0x20] sm:$0xff] %vm1552_vm0, %v1540_v46 }
 0x3ec   : > { %v1517_v39 = vpop.xlane.xlu1 %1516  ;;  %v1515_v47 = vpop.xlane.xlu0 %1514 }
 0x3ed   : > { %v1543_v48 = vadd.f32 %v1535_v33, %v1517_v39  ;;  %v1542_v49 = vadd.f32 %v1535_v33, %v1515_v47 }
 0x3ef   : > { %1560 = vst.msk [vmem:[%s2770_s26 + $0x38] sm:$0xff] %vm1552_vm0, %v1543_v48  ;;  %1559 = vst.msk [vmem:[%s2770_s26 + $0x30] sm:$0xff] %vm1552_vm0, %v1542_v49 }
 0x3f0   : > { %v1521_v6 = vpop.xlane.xlu1 %1520  ;;  %v1519_v50 = vpop.xlane.xlu0 %1518 }
 0x3f1   : > { %v1545_v9 = vadd.f32 %v1535_v33, %v1521_v6  ;;  %v1544_v52 = vadd.f32 %v1535_v33, %v1519_v50 }
 0x3f3   : > { %1562 = vst.msk [vmem:[%s2770_s26 + $0x48] sm:$0xff] %vm1552_vm0, %v1545_v9  ;;  %1561 = vst.msk [vmem:[%s2770_s26 + $0x40] sm:$0xff] %vm1552_vm0, %v1544_v52 }
 0x3f4   : > { %v1525_v45 = vpop.xlane.xlu1 %1524  ;;  %v1523_v53 = vpop.xlane.xlu0 %1522 }
 0x3f5   : > { %v1547_v54 = vadd.f32 %v1535_v33, %v1525_v45  ;;  %v1546_v12 = vadd.f32 %v1535_v33, %v1523_v53 }
 0x3f7   : > { %1564 = vst.msk [vmem:[%s2770_s26 + $0x58] sm:$0xff] %vm1552_vm0, %v1547_v54  ;;  %1563 = vst.msk [vmem:[%s2770_s26 + $0x50] sm:$0xff] %vm1552_vm0, %v1546_v12 }
 0x3f8   : > { %v1529_v7 = vpop.xlane.xlu1 %1528  ;;  %v1527_v13 = vpop.xlane.xlu0 %1526 }
 0x3f9   : > { %v1549_v56 = vadd.f32 %v1535_v33, %v1529_v7  ;;  %v1548_v4 = vadd.f32 %v1535_v33, %v1527_v13 }
 0x3fb   : > { %1566 = vst.msk [vmem:[%s2770_s26 + $0x68] sm:$0xff] %vm1552_vm0, %v1549_v56  ;;  %1565 = vst.msk [vmem:[%s2770_s26 + $0x60] sm:$0xff] %vm1552_vm0, %v1548_v4 }
 0x3fc   : > { %v1533_v57 = vpop.xlane.xlu1 %1532  ;;  %v1531_v17 = vpop.xlane.xlu0 %1530 }
 0x3fd   : > { %v1551_v55 = vadd.f32 %v1535_v33, %v1533_v57  ;;  %v1550_v14 = vadd.f32 %v1535_v33, %v1531_v17 }
 0x3ff   : > { %1568 = vst.msk [vmem:[%s2770_s26 + $0x78] sm:$0xff] %vm1552_vm0, %v1551_v55  ;;  %1567 = vst.msk [vmem:[%s2770_s26 + $0x70] sm:$0xff] %vm1552_vm0, %v1550_v14 }
 0x400 PF: > { %s25_s24 = sadd.s32 1, %s2436_s24   ;;  %s3108_s0 = sld [smem:[#allocation19_spill]] }
 0x401   : > { %p22_p0 = scmp.ge.s32.totalorder %s25_s24, 6   ;;  %s3109_s10 = sld [smem:[#allocation14_spill]] }
 0x402   : > { %s3110_s20 = sld [smem:[#allocation20_spill]]  ;;  %s3115_s15 = smov %s2400_s16 }
 0x403   : > { %s3111_s21 = sld [smem:[#allocation15_spill]]  ;;  %s3116_s16 = smov %s2404_s17 }
 0x404   : > { %s3112_s22 = sld [smem:[#allocation16_spill]]  ;;  %s3118_s18 = smov %s2412_s19 }
 0x405   : > { %s3113_s9 = sld [smem:[#allocation17_spill]]  ;;  %24 = sbr.rel (!%p22_p0) target bundleno = 16 (0x10), region = 151 }
 0x406   : > { %s3114_s23 = sld [smem:[#allocation18_spill]]  ;;  %s3117_s17 = smov %s3108_s0 }
 0x407   : > { %s3119_s19 = smov %s3109_s10 }
 0x40a   :  { %1591 = vsyncpa [#allocation5], 1 }
 0x40b   :  { %1593 = vsyncpa [#allocation5 + $0x1], 1 }
 0x40c   :  { %1594 = vsyncpa [#allocation7], 1 }

</bundles_post_ra>
